<compile_context>
chip_gen: v6e
topology: v6e:2x2x1
jax: 0.10.0
libtpu: 0.0.40
codegen_flags: <defaults>
</compile_context>

<pallas_src>
import jax
import jax.numpy as jnp
from jax.experimental import pallas as pl
from jax.experimental.pallas import tpu as pltpu


def _round_up(x, m):
    return (x + m - 1) // m * m


def _pick_tile(dim_pad, desired):
    """Largest multiple of 128 that divides dim_pad and is <= desired."""
    t = max(128, min((desired // 128) * 128, dim_pad))
    while dim_pad % t:
        t -= 128
    return t


def _transform_kernel(x_ref, w_ref, lw_ref, msg_ref, loop_ref, acc_m, acc_l):
    """msg = feat @ W (bf16 out), loop = feat @ loop_W^T (f32 out).

    feat is streamed through the MXU once per (i, k) tile and feeds both
    products, so the two outputs cost one pass over feat.
    """
    k = pl.program_id(2)

    @pl.when(k == 0)
    def _():
        acc_m[...] = jnp.zeros_like(acc_m)
        acc_l[...] = jnp.zeros_like(acc_l)

    x = x_ref[...]
    acc_m[...] += jnp.dot(x, w_ref[...], preferred_element_type=jnp.float32)
    acc_l[...] += jnp.dot(x, lw_ref[...], preferred_element_type=jnp.float32)

    @pl.when(k == pl.num_programs(2) - 1)
    def _():
        msg_ref[...] = acc_m[...].astype(msg_ref.dtype)    # bf16 message
        loop_ref[...] = acc_l[...].astype(loop_ref.dtype)  # f32 residual


def _make_aggregate_kernel(bk, msg_resident):
    """out = (adj @ msg) * inv_deg + bias + loop, bf16 x bf16 MXU, f32 acc."""

    def kernel(adj_ref, msg_ref, loop_ref, invdeg_ref, bias_ref,
               out_ref, acc_ref):
        k = pl.program_id(2)

        @pl.when(k == 0)
        def _():
            acc_ref[...] = jnp.zeros_like(acc_ref)

        if msg_resident:
            # Whole (n_pad, bn) bf16 message panel is VMEM-resident; take the
            # current k sub-block without any extra HBM traffic.
            start = pl.multiple_of(k * bk, bk)
            h = msg_ref[pl.ds(start, bk), :]
        else:
            h = msg_ref[...]

        # bf16 adj ({0,1} exact) x bf16 msg -> native MXU path, f32 accumulate.
        acc_ref[...] += jnp.dot(adj_ref[...], h,
                                preferred_element_type=jnp.float32)

        @pl.when(k == pl.num_programs(2) - 1)
        def _():
            rst = acc_ref[...] * invdeg_ref[...]      # norm == 'right'
            rst = rst + bias_ref[...]                 # bias
            # activation is None in this configuration
            out_ref[...] = (rst + loop_ref[...]).astype(out_ref.dtype)

    return kernel


def graph_conv(adj, feat, weight, loop_weight, bias, *,
               bm=512, bk=512, bn_max=512,
               vmem_limit_bytes=48 * 1024 * 1024):
    """adj: [N, N] (adj[d, s] = 1 iff edge s->d), feat: [N, Fi],
    weight: [Fi, Fo], loop_weight: [Fo, Fi] (nn.Linear layout), bias: [Fo]."""
    N, Fi = feat.shape
    Fo = weight.shape[1]

    # ---- pad to 128-multiples only (zero fill -> numerics unchanged) ----
    n_pad = _round_up(N, 128)
    fi_pad = _round_up(Fi, 128)
    fo_pad = _round_up(Fo, 128)

    # adj goes straight into a bf16 buffer ({0,1} cast is exact) -- the f32
    # padded N^2 array is never materialized.
    adj_p = jnp.zeros((n_pad, n_pad), jnp.bfloat16).at[:N, :N].set(
        adj.astype(jnp.bfloat16))
    feat_p = jnp.zeros((n_pad, fi_pad), jnp.float32).at[:N, :Fi].set(feat)
    w_p = jnp.zeros((fi_pad, fo_pad), jnp.float32).at[:Fi, :Fo].set(weight)
    lw_p = jnp.zeros((fi_pad, fo_pad), jnp.float32).at[:Fi, :Fo].set(
        loop_weight.T)
    bias_p = jnp.zeros((1, fo_pad), jnp.float32).at[0, :Fo].set(bias)

    # norm == 'right': 1 / in_degrees.clamp(min=1), from the *unpadded* adj.
    deg = jnp.maximum(
        jnp.sum(adj.astype(jnp.float32), axis=1, keepdims=True), 1.0)
    inv_deg = jnp.ones((n_pad, 1), jnp.float32).at[:N].set(1.0 / deg)

    cparams = pltpu.CompilerParams(
        dimension_semantics=("parallel", "parallel", "arbitrary"),
        vmem_limit_bytes=vmem_limit_bytes)

    # ---- kernel 1: msg (bf16) = feat @ W ; loop (f32) = feat @ loop_W^T ----
    bm1 = _pick_tile(n_pad, bm)
    bk1 = _pick_tile(fi_pad, bk)
    bn1 = _pick_tile(fo_pad, 256)

    msg, loop_msg = pl.pallas_call(
        _transform_kernel,
        out_shape=(jax.ShapeDtypeStruct((n_pad, fo_pad), jnp.bfloat16),
                   jax.ShapeDtypeStruct((n_pad, fo_pad), jnp.float32)),
        grid_spec=pltpu.PrefetchScalarGridSpec(
            num_scalar_prefetch=0,
            grid=(n_pad // bm1, fo_pad // bn1, fi_pad // bk1),
            in_specs=[
                pl.BlockSpec((bm1, bk1), lambda i, j, k: (i, k)),   # feat
                pl.BlockSpec((bk1, bn1), lambda i, j, k: (k, j)),   # W
                pl.BlockSpec((bk1, bn1), lambda i, j, k: (k, j)),   # loop_W^T
            ],
            out_specs=[
                pl.BlockSpec((bm1, bn1), lambda i, j, k: (i, j)),   # msg
                pl.BlockSpec((bm1, bn1), lambda i, j, k: (i, j)),   # loop
            ],
            scratch_shapes=[pltpu.VMEM((bm1, bn1), jnp.float32),
                            pltpu.VMEM((bm1, bn1), jnp.float32)]),
        compiler_params=cparams,
    )(feat_p, w_p, lw_p)

    # ---- kernel 2: out = (adj @ msg) * inv_deg + bias + loop ----
    bm2 = _pick_tile(n_pad, bm)
    bk2 = _pick_tile(n_pad, bk)
    bn2 = fo_pad if fo_pad <= bn_max else _pick_tile(fo_pad, 256)

    # v7x has 2 TensorCores: keep at least one "parallel" grid extent >= 2
    # when the problem is large enough for that to matter.
    while (n_pad // bm2) < 2 and (fo_pad // bn2) < 2 and bm2 > 128:
        bm2 = _pick_tile(n_pad, bm2 - 128)

    def _k2_vmem_bytes(msg_rows):
        return (2 * bm2 * bk2 * 2            # adj   (bf16, double buffered)
                + 2 * msg_rows * bn2 * 2     # msg   (bf16)
                + 2 * bm2 * bn2 * 4          # loop  (f32)
                + 2 * bm2 * bn2 * 4          # out   (f32)
                + bm2 * bn2 * 4              # acc scratch
                + 2 * bm2 * 128 * 4          # inv_deg (lane padded)
                + 2 * 8 * bn2 * 4)           # bias

    # Keep the whole bf16 message panel resident when it fits a conservative
    # (v7x 64 MiB-safe) budget: it is then fetched once per j instead of once
    # per (i, j) output row-panel.
    vmem_budget = min(vmem_limit_bytes, 40 * 1024 * 1024)
    msg_resident = _k2_vmem_bytes(n_pad) <= vmem_budget

    if msg_resident:
        msg_spec = pl.BlockSpec((n_pad, bn2), lambda i, j, k: (0, j))
    else:
        msg_spec = pl.BlockSpec((bk2, bn2), lambda i, j, k: (k, j))

    out_p = pl.pallas_call(
        _make_aggregate_kernel(bk2, msg_resident),
        out_shape=jax.ShapeDtypeStruct((n_pad, fo_pad), jnp.float32),
        grid_spec=pltpu.PrefetchScalarGridSpec(
            num_scalar_prefetch=0,
            grid=(n_pad // bm2, fo_pad // bn2, n_pad // bk2),
            in_specs=[
                pl.BlockSpec((bm2, bk2), lambda i, j, k: (i, k)),   # adj
                msg_spec,                                           # msg (bf16)
                pl.BlockSpec((bm2, bn2), lambda i, j, k: (i, j)),   # loop (f32)
                pl.BlockSpec((bm2, 1), lambda i, j, k: (i, 0)),     # 1/deg
                pl.BlockSpec((1, bn2), lambda i, j, k: (0, j)),     # bias
            ],
            out_specs=pl.BlockSpec((bm2, bn2), lambda i, j, k: (i, j)),
            scratch_shapes=[pltpu.VMEM((bm2, bn2), jnp.float32)]),
        compiler_params=cparams,
    )(adj_p, msg, loop_msg, inv_deg, bias_p)

    return out_p[:N, :Fo]


if __name__ == "__main__":
    def run_case(N, Fi, Fo, density, seed):
        key = jax.random.PRNGKey(seed)
        k_adj, k_feat, k_w, k_loop = jax.random.split(key, 4)

        # Random graph + self-loops (the module forbids 0-in-degree nodes).
        edges = (jax.random.uniform(k_adj, (N, N)) < density).astype(jnp.float32)
        adj = jnp.maximum(edges, jnp.eye(N, dtype=jnp.float32))

        feat = jax.random.normal(k_feat, (N, Fi), dtype=jnp.float32)

        # xavier_uniform_ for self.weight : U(-b, b), b = sqrt(6/(Fi+Fo))
        b_w = (6.0 / (Fi + Fo)) ** 0.5
        weight = jax.random.uniform(k_w, (Fi, Fo), jnp.float32, -b_w, b_w)

        # nn.Linear default init -> U(-1/sqrt(Fi), 1/sqrt(Fi))
        b_l = 1.0 / (Fi ** 0.5)
        loop_weight = jax.random.uniform(k_loop, (Fo, Fi), jnp.float32, -b_l, b_l)

        # init.zeros_ for bias
        bias = jnp.zeros((Fo,), jnp.float32)

        out = jax.block_until_ready(
            graph_conv(adj, feat, weight, loop_weight, bias))

        # References (full-precision matmuls for a trustworthy baseline).
        mm = lambda a, b: jnp.matmul(a, b, precision=jax.lax.Precision.HIGHEST)
        deg = jnp.maximum(jnp.sum(adj, axis=1, keepdims=True), 1.0)
        loop_ref = mm(feat, loop_weight.T)
        msg_f32 = mm(feat, weight)
        # Module-exact f32 reference (in_feats > out_feats branch).
        ref_f32 = mm(adj, msg_f32) / deg + bias + loop_ref
        # Reference with the same bf16 message quantization the kernel uses.
        msg_q = msg_f32.astype(jnp.bfloat16).astype(jnp.float32)
        ref_q = mm(adj, msg_q) / deg + bias + loop_ref

        assert out.shape == (N, Fo)
        err_q = float(jnp.abs(out - ref_q).max())
        err_f = float(jnp.abs(out - ref_f32).max())
        assert jnp.allclose(out, ref_q, atol=5e-3, rtol=5e-3), err_q
        assert jnp.allclose(out, ref_f32, atol=5e-2, rtol=5e-2), err_f

    # Tiny case (single-tile grid), in_feats > out_feats as in the module's
    # first branch; and a multi-tile case that exercises the k reduction loop,
    # the pl.when init/finalize and the resident-message pl.ds path.
    run_case(N=16, Fi=32, Fo=16, density=0.3, seed=0)
    run_case(N=640, Fi=160, Fo=96, density=0.05, seed=1)

    print("KERNEL_OK")
</pallas_src>

<mosaic_0001>
module attributes {stable_mosaic.version = 11 : i64} {
  func.func @_transform_kernel(%arg0: i32, %arg1: i32, %arg2: i32, %arg3: memref<128x128xf32, #tpu.memory_space<vmem>>, %arg4: memref<128x128xf32, #tpu.memory_space<vmem>>, %arg5: memref<128x128xf32, #tpu.memory_space<vmem>>, %arg6: memref<128x128xbf16, #tpu.memory_space<vmem>>, %arg7: memref<128x128xf32, #tpu.memory_space<vmem>>, %arg8: memref<128x128xf32, #tpu.memory_space<vmem>>, %arg9: memref<128x128xf32, #tpu.memory_space<vmem>>) attributes {dimension_semantics = [#tpu.dimension_semantics<parallel>, #tpu.dimension_semantics<parallel>, #tpu.dimension_semantics<arbitrary>], iteration_bounds = array<i64: 1, 1, 1>, scalar_prefetch = 0 : i64, scratch_operands = 2 : i64, tpu.core_type = #tpu.core_type<tc>, window_params = [{transform_indices = @transform_0, window_bounds = array<i64: 128, 128>}, {transform_indices = @transform_1, window_bounds = array<i64: 128, 128>}, {transform_indices = @transform_2, window_bounds = array<i64: 128, 128>}, {transform_indices = @transform_3, window_bounds = array<i64: 128, 128>}, {transform_indices = @transform_4, window_bounds = array<i64: 128, 128>}]} {
    %c0_i32 = arith.constant 0 : i32
    %0 = arith.cmpi eq, %arg2, %c0_i32 : i32
    %1 = arith.extui %0 : i1 to i32
    %c0_i32_0 = arith.constant 0 : i32
    %2 = arith.cmpi ne, %1, %c0_i32_0 : i32
    scf.if %2 {
      %cst_17 = arith.constant 0.000000e+00 : f32
      %17 = vector.broadcast %cst_17 : f32 to vector<128x128xf32>
      %c0_18 = arith.constant 0 : index
      %c0_19 = arith.constant 0 : index
      %18 = vector.load %arg8[%c0_18, %c0_19] : memref<128x128xf32, #tpu.memory_space<vmem>>, vector<128x128xf32>
      tpu.vector_store %arg8[%c0_18, %c0_19], %17 {strides = array<i32>} : memref<128x128xf32, #tpu.memory_space<vmem>>, vector<128x128xf32>,
      %cst_20 = arith.constant 0.000000e+00 : f32
      %19 = vector.broadcast %cst_20 : f32 to vector<128x128xf32>
      %c0_21 = arith.constant 0 : index
      %c0_22 = arith.constant 0 : index
      %20 = vector.load %arg9[%c0_21, %c0_22] : memref<128x128xf32, #tpu.memory_space<vmem>>, vector<128x128xf32>
      tpu.vector_store %arg9[%c0_21, %c0_22], %19 {strides = array<i32>} : memref<128x128xf32, #tpu.memory_space<vmem>>, vector<128x128xf32>,
    } else {
    }
    %c0 = arith.constant 0 : index
    %c0_1 = arith.constant 0 : index
    %3 = vector.load %arg3[%c0, %c0_1] : memref<128x128xf32, #tpu.memory_space<vmem>>, vector<128x128xf32>
    %c0_2 = arith.constant 0 : index
    %c0_3 = arith.constant 0 : index
    %4 = vector.load %arg8[%c0_2, %c0_3] : memref<128x128xf32, #tpu.memory_space<vmem>>, vector<128x128xf32>
    %c0_4 = arith.constant 0 : index
    %c0_5 = arith.constant 0 : index
    %5 = vector.load %arg4[%c0_4, %c0_5] : memref<128x128xf32, #tpu.memory_space<vmem>>, vector<128x128xf32>
    %cst = arith.constant dense<0.000000e+00> : vector<128x128xf32>
    %6 = tpu.matmul %3, %5, %cst {dimension_numbers = #tpu.dot_dimension_numbers<[1], [0], [0], [1], [0, 0, 1, 1], [], []>} : vector<128x128xf32>, vector<128x128xf32>, vector<128x128xf32> -> vector<128x128xf32>
    %7 = arith.addf %4, %6 : vector<128x128xf32>
    %c0_6 = arith.constant 0 : index
    %c0_7 = arith.constant 0 : index
    %8 = vector.load %arg8[%c0_6, %c0_7] : memref<128x128xf32, #tpu.memory_space<vmem>>, vector<128x128xf32>
    tpu.vector_store %arg8[%c0_6, %c0_7], %7 {strides = array<i32>} : memref<128x128xf32, #tpu.memory_space<vmem>>, vector<128x128xf32>,
    %c0_8 = arith.constant 0 : index
    %c0_9 = arith.constant 0 : index
    %9 = vector.load %arg9[%c0_8, %c0_9] : memref<128x128xf32, #tpu.memory_space<vmem>>, vector<128x128xf32>
    %c0_10 = arith.constant 0 : index
    %c0_11 = arith.constant 0 : index
    %10 = vector.load %arg5[%c0_10, %c0_11] : memref<128x128xf32, #tpu.memory_space<vmem>>, vector<128x128xf32>
    %cst_12 = arith.constant dense<0.000000e+00> : vector<128x128xf32>
    %11 = tpu.matmul %3, %10, %cst_12 {dimension_numbers = #tpu.dot_dimension_numbers<[1], [0], [0], [1], [0, 0, 1, 1], [], []>} : vector<128x128xf32>, vector<128x128xf32>, vector<128x128xf32> -> vector<128x128xf32>
    %12 = arith.addf %9, %11 : vector<128x128xf32>
    %c0_13 = arith.constant 0 : index
    %c0_14 = arith.constant 0 : index
    %13 = vector.load %arg9[%c0_13, %c0_14] : memref<128x128xf32, #tpu.memory_space<vmem>>, vector<128x128xf32>
    tpu.vector_store %arg9[%c0_13, %c0_14], %12 {strides = array<i32>} : memref<128x128xf32, #tpu.memory_space<vmem>>, vector<128x128xf32>,
    %c0_i32_15 = arith.constant 0 : i32
    %14 = arith.cmpi eq, %arg2, %c0_i32_15 : i32
    %15 = arith.extui %14 : i1 to i32
    %c0_i32_16 = arith.constant 0 : i32
    %16 = arith.cmpi ne, %15, %c0_i32_16 : i32
    scf.if %16 {
      %c0_17 = arith.constant 0 : index
      %c0_18 = arith.constant 0 : index
      %17 = vector.load %arg8[%c0_17, %c0_18] : memref<128x128xf32, #tpu.memory_space<vmem>>, vector<128x128xf32>
      %18 = arith.truncf %17 : vector<128x128xf32> to vector<128x128xbf16>
      %c0_19 = arith.constant 0 : index
      %c0_20 = arith.constant 0 : index
      %19 = vector.load %arg6[%c0_19, %c0_20] : memref<128x128xbf16, #tpu.memory_space<vmem>>, vector<128x128xbf16>
      tpu.vector_store %arg6[%c0_19, %c0_20], %18 {strides = array<i32>} : memref<128x128xbf16, #tpu.memory_space<vmem>>, vector<128x128xbf16>,
      %c0_21 = arith.constant 0 : index
      %c0_22 = arith.constant 0 : index
      %20 = vector.load %arg9[%c0_21, %c0_22] : memref<128x128xf32, #tpu.memory_space<vmem>>, vector<128x128xf32>
      %c0_23 = arith.constant 0 : index
      %c0_24 = arith.constant 0 : index
      %21 = vector.load %arg7[%c0_23, %c0_24] : memref<128x128xf32, #tpu.memory_space<vmem>>, vector<128x128xf32>
      tpu.vector_store %arg7[%c0_23, %c0_24], %20 {strides = array<i32>} : memref<128x128xf32, #tpu.memory_space<vmem>>, vector<128x128xf32>,
    } else {
    }
    return
  }
  func.func @transform_0(%arg0: i32, %arg1: i32, %arg2: i32) -> (i32, i32) {
    %c0_i32 = arith.constant 0 : i32
    return %arg0, %arg2 : i32, i32
  }
  func.func @transform_1(%arg0: i32, %arg1: i32, %arg2: i32) -> (i32, i32) {
    %c0_i32 = arith.constant 0 : i32
    return %arg2, %arg1 : i32, i32
  }
  func.func @transform_2(%arg0: i32, %arg1: i32, %arg2: i32) -> (i32, i32) {
    %c0_i32 = arith.constant 0 : i32
    return %arg2, %arg1 : i32, i32
  }
  func.func @transform_3(%arg0: i32, %arg1: i32, %arg2: i32) -> (i32, i32) {
    %c0_i32 = arith.constant 0 : i32
    return %arg0, %arg1 : i32, i32
  }
  func.func @transform_4(%arg0: i32, %arg1: i32, %arg2: i32) -> (i32, i32) {
    %c0_i32 = arith.constant 0 : i32
    return %arg0, %arg1 : i32, i32
  }
}

</mosaic_0001>

<bundles_post_ra>
// kernel: tpu_custom_call.1
= control target key start
LH: loop header
LB: loop body
LE: loop exit
PB: predicated region body
PF: predicated region fallthrough
CT: control target
= control target key end

     0   :  { %10 = vsyncpa [#allocation5], 0  ;;  %s1127_s0 = inlined_call_operand.hbm [shape: f32[128,128], index: 0, kind: input, shape index: {}]   ;;  %s1128_s1 = inlined_call_operand.hbm [shape: f32[128,128], index: 1, kind: input, shape index: {}]   ;;  %s1129_s2 = inlined_call_operand.hbm [shape: f32[128,128], index: 2, kind: input, shape index: {}]   ;;  %s1130_s3 = inlined_call_operand.hbm [shape: bf16[128,128], index: 3, kind: output, shape index: {0}]   ;;  %s1131_s4 = inlined_call_operand.hbm [shape: f32[128,128], index: 4, kind: output, shape index: {1}]  }
   0x1   :  { %11 = vsyncpa [#allocation8], 0 }
   0x2   :  { %12 = vsyncpa [#allocation6], 0 }
   0x3   :  { %13 = vsyncpa [#allocation12], 0  ;;  %s1066_s15 = smov [#allocation7]   ;;  %s1067_s17 = smov [#allocation4]  }
   0x4   :  { %s31_s16 = sshll.u32 %s1066_s15, 4  ;;  %s19_s18 = sshll.u32 %s1067_s17, 4  ;;  %s32_s16 = int_to_ptr.vmem [resolvable:$true] %s31_s16  ;;  %s20_s18 = int_to_ptr.vmem [resolvable:$true] %s19_s18 }
   0x5   :  { %s966_s19 = scalar_lea.vmem %s32_s16, 2048  ;;  %p971_p1 = scmp.lt.s32.totalorder %s32_s16, %s32_s16 }
   0x6   :  { %p967_p0 = scmp.ne.s32.totalorder %s32_s16, %s966_s19  ;;  %p972_p2 = scmp.lt.s32.totalorder %s966_s19, %s966_s19 }
   0x8   :  { %p973_p3 = por %p972_p2, %p971_p1 }
   0xa   :  { %p974_p4 = pnand %p973_p3, %p967_p0 }
   0xc   :  { %977 = shalt.err (!%p974_p4)
}
   0xd   :  { %s1068_s20 = smov 128   ;;  %s1069_s21 = smov 8  }
   0xe   :  { %37 = dma.hbm_to_vmem [thread:$0]  %s1128_s1, 2048, %s32_s16, [#allocation8], %s1068_s20, %s1068_s20, %s1069_s21  }
   0xf   :  { %s986_s24 = scalar_lea.vmem %s20_s18, 2048  ;;  %p991_p6 = scmp.lt.s32.totalorder %s20_s18, %s20_s18 }
  0x10   :  { %p987_p5 = scmp.ne.s32.totalorder %s20_s18, %s986_s24  ;;  %p992_p7 = scmp.lt.s32.totalorder %s986_s24, %s986_s24 }
  0x12   :  { %p993_p8 = por %p992_p7, %p991_p6 }
  0x14   :  { %p994_p9 = pnand %p993_p8, %p987_p5 }
  0x16   :  { %997 = shalt.err (!%p994_p9)
}
  0x17   :  { %25 = dma.hbm_to_vmem [thread:$0]  %s1127_s0, 2048, %s20_s18, [#allocation5], %s1068_s20, %s1068_s20, %s1069_s21  }
  0x18   :  { %s1070_s27 = smov [#allocation9]  }
  0x19   :  { %s43_s28 = sshll.u32 %s1070_s27, 4  ;;  %s44_s28 = int_to_ptr.vmem [resolvable:$true] %s43_s28 }
  0x1a   :  { %s1006_s29 = scalar_lea.vmem %s44_s28, 2048  ;;  %p1011_p11 = scmp.lt.s32.totalorder %s44_s28, %s44_s28 }
  0x1b   :  { %p1007_p10 = scmp.ne.s32.totalorder %s44_s28, %s1006_s29  ;;  %p1012_p12 = scmp.lt.s32.totalorder %s1006_s29, %s1006_s29 }
  0x1d   :  { %p1013_p13 = por %p1012_p12, %p1011_p11 }
  0x1f   :  { %p1014_p0 = pnand %p1013_p13, %p1007_p10 }
  0x21   :  { %1017 = shalt.err (!%p1014_p0)
}
  0x22   :  { %49 = dma.hbm_to_vmem [thread:$0]  %s1129_s2, 2048, %s44_s28, [#allocation8], %s1068_s20, %s1068_s20, %s1069_s21  }
  0x23   :  { %1058 = dma.done.wait [#allocation5], 2048  }
  0x24   :  { %1059 = vsyncadd [#allocation5], 4294965248 }
  0x25   :  { %1060 = dma.done.wait [#allocation8], 4096  }
  0x26   :  { %1061 = vsyncadd [#allocation8], 4294963200  ;;  %v142_v0 = vld [vmem:[#allocation7 + $0x78] sm:$0xff]  ;;  %v141_v2 = vld [vmem:[#allocation7 + $0x70] sm:$0xff]  ;;  %s1071_s0 = smov [#allocation11]   ;;  %s1072_s5 = smov [#allocation10]  }
  0x27   :  { %v351_v1 = vld [vmem:[#allocation9 + $0x78] sm:$0xff]  ;;  %837 = vmatprep.subr.mxu0 %v142_v0  ;;  %v350_v3 = vld [vmem:[#allocation9 + $0x70] sm:$0xff]  ;;  %v140_v4 = vld [vmem:[#allocation7 + $0x68] sm:$0xff]  ;;  %s677_s2 = sshll.u32 %s1071_s0, 4  ;;  %s665_s6 = sshll.u32 %s1072_s5, 4  ;;  %s678_s2 = int_to_ptr.vmem [resolvable:$true] %s677_s2  ;;  %s666_s6 = int_to_ptr.vmem [resolvable:$true] %s665_s6 }
  0x28   :  { %893 = vmatprep.subr.mxu1 %v351_v1  ;;  %838 = vmatpush3.msra.mxu0 %v142_v0  ;;  %v349_v5 = vld [vmem:[#allocation9 + $0x68] sm:$0xff]  ;;  %v139_v6 = vld [vmem:[#allocation7 + $0x60] sm:$0xff]  ;;  %v138_v8 = vld [vmem:[#allocation7 + $0x58] sm:$0xff]  ;;  %s1018_s7 = scalar_lea.vmem %s678_s2, 2048  ;;  %p1023_p2 = scmp.lt.s32.totalorder %s678_s2, %s678_s2 }
  0x29   :  { %894 = vmatpush3.msra.mxu1 %v351_v1  ;;  %839 = vmatprep.subr.mxu0 %v141_v2  ;;  %v348_v7 = vld [vmem:[#allocation9 + $0x60] sm:$0xff]  ;;  %v347_v9 = vld [vmem:[#allocation9 + $0x58] sm:$0xff]  ;;  %v137_v10 = vld [vmem:[#allocation7 + $0x50] sm:$0xff]  ;;  %p1019_p1 = scmp.ne.s32.totalorder %s678_s2, %s1018_s7  ;;  %p1024_p3 = scmp.lt.s32.totalorder %s1018_s7, %s1018_s7 }
  0x2a   :  { %895 = vmatprep.subr.mxu1 %v350_v3  ;;  %840 = vmatpush3.msra.mxu0 %v141_v2  ;;  %v346_v11 = vld [vmem:[#allocation9 + $0x50] sm:$0xff]  ;;  %v136_v12 = vld [vmem:[#allocation7 + $0x48] sm:$0xff]  ;;  %v135_v14 = vld [vmem:[#allocation7 + $0x40] sm:$0xff] }
  0x2b   :  { %896 = vmatpush3.msra.mxu1 %v350_v3  ;;  %841 = vmatprep.subr.mxu0 %v140_v4  ;;  %v345_v13 = vld [vmem:[#allocation9 + $0x48] sm:$0xff]  ;;  %v344_v15 = vld [vmem:[#allocation9 + $0x40] sm:$0xff]  ;;  %v134_v16 = vld [vmem:[#allocation7 + $0x38] sm:$0xff]  ;;  %p1025_p4 = por %p1024_p3, %p1023_p2 }
  0x2c   :  { %897 = vmatprep.subr.mxu1 %v349_v5  ;;  %842 = vmatpush3.msra.mxu0 %v140_v4  ;;  %v343_v17 = vld [vmem:[#allocation9 + $0x38] sm:$0xff]  ;;  %v133_v18 = vld [vmem:[#allocation7 + $0x30] sm:$0xff]  ;;  %v132_v20 = vld [vmem:[#allocation7 + $0x28] sm:$0xff] }
  0x2d   :  { %898 = vmatpush3.msra.mxu1 %v349_v5  ;;  %843 = vmatprep.subr.mxu0 %v139_v6  ;;  %v342_v19 = vld [vmem:[#allocation9 + $0x30] sm:$0xff]  ;;  %v341_v21 = vld [vmem:[#allocation9 + $0x28] sm:$0xff]  ;;  %v131_v22 = vld [vmem:[#allocation7 + $0x20] sm:$0xff]  ;;  %p1026_p5 = pnand %p1025_p4, %p1019_p1 }
  0x2e   :  { %899 = vmatprep.subr.mxu1 %v348_v7  ;;  %844 = vmatpush3.msra.mxu0 %v139_v6  ;;  %v340_v23 = vld [vmem:[#allocation9 + $0x20] sm:$0xff]  ;;  %v130_v24 = vld [vmem:[#allocation7 + $0x18] sm:$0xff]  ;;  %v129_v26 = vld [vmem:[#allocation7 + $0x10] sm:$0xff] }
  0x2f   :  { %900 = vmatpush3.msra.mxu1 %v348_v7  ;;  %845 = vmatprep.subr.mxu0 %v138_v8  ;;  %v339_v25 = vld [vmem:[#allocation9 + $0x18] sm:$0xff]  ;;  %v338_v27 = vld [vmem:[#allocation9 + $0x10] sm:$0xff]  ;;  %v128_v28 = vld [vmem:[#allocation7 + $0x8] sm:$0xff] }
  0x30   :  { %901 = vmatprep.subr.mxu1 %v347_v9  ;;  %846 = vmatpush3.msra.mxu0 %v138_v8  ;;  %v337_v29 = vld [vmem:[#allocation9 + $0x8] sm:$0xff]  ;;  %v127_v30 = vld [vmem:[#allocation7] sm:$0xff]  ;;  %v97_v34 = vld [vmem:[#allocation4 + $0x10] sm:$0xff] }
  0x31   :  { %902 = vmatpush3.msra.mxu1 %v347_v9  ;;  %847 = vmatprep.subr.mxu0 %v137_v10  ;;  %v336_v31 = vld [vmem:[#allocation9] sm:$0xff]  ;;  %v96_v33 = vld [vmem:[#allocation4 + $0x8] sm:$0xff]  ;;  %v98_v35 = vld [vmem:[#allocation4 + $0x18] sm:$0xff] }
  0x32   :  { %903 = vmatprep.subr.mxu1 %v346_v11  ;;  %848 = vmatpush3.msra.mxu0 %v137_v10  ;;  %v95_v32 = vld [vmem:[#allocation4] sm:$0xff]  ;;  %v100_v37 = vld [vmem:[#allocation4 + $0x28] sm:$0xff]  ;;  %v101_v38 = vld [vmem:[#allocation4 + $0x30] sm:$0xff] }
  0x33   :  { %904 = vmatpush3.msra.mxu1 %v346_v11  ;;  %849 = vmatprep.subr.mxu0 %v136_v12  ;;  %v99_v36 = vld [vmem:[#allocation4 + $0x20] sm:$0xff]  ;;  %v102_v39 = vld [vmem:[#allocation4 + $0x38] sm:$0xff]  ;;  %v104_v41 = vld [vmem:[#allocation4 + $0x48] sm:$0xff] }
  0x34   :  { %905 = vmatprep.subr.mxu1 %v345_v13  ;;  %850 = vmatpush3.msra.mxu0 %v136_v12  ;;  %v103_v40 = vld [vmem:[#allocation4 + $0x40] sm:$0xff]  ;;  %v105_v42 = vld [vmem:[#allocation4 + $0x50] sm:$0xff]  ;;  %v106_v43 = vld [vmem:[#allocation4 + $0x58] sm:$0xff] }
  0x35   :  { %906 = vmatpush3.msra.mxu1 %v345_v13  ;;  %851 = vmatprep.subr.mxu0 %v135_v14  ;;  %v107_v44 = vld [vmem:[#allocation4 + $0x60] sm:$0xff]  ;;  %v108_v45 = vld [vmem:[#allocation4 + $0x68] sm:$0xff]  ;;  %v109_v46 = vld [vmem:[#allocation4 + $0x70] sm:$0xff] }
  0x36   :  { %907 = vmatprep.subr.mxu1 %v344_v15  ;;  %852 = vmatpush3.msra.mxu0 %v135_v14  ;;  %v110_v47 = vld [vmem:[#allocation4 + $0x78] sm:$0xff] }
  0x37   :  { %908 = vmatpush3.msra.mxu1 %v344_v15  ;;  %853 = vmatprep.subr.mxu0 %v134_v16 }
  0x38   :  { %909 = vmatprep.subr.mxu1 %v343_v17  ;;  %854 = vmatpush3.msra.mxu0 %v134_v16 }
  0x39   :  { %910 = vmatpush3.msra.mxu1 %v343_v17  ;;  %855 = vmatprep.subr.mxu0 %v133_v18 }
  0x3a   :  { %911 = vmatprep.subr.mxu1 %v342_v19  ;;  %856 = vmatpush3.msra.mxu0 %v133_v18 }
  0x3b   :  { %912 = vmatpush3.msra.mxu1 %v342_v19  ;;  %857 = vmatprep.subr.mxu0 %v132_v20 }
  0x3c   :  { %913 = vmatprep.subr.mxu1 %v341_v21  ;;  %858 = vmatpush3.msra.mxu0 %v132_v20 }
  0x3d   :  { %914 = vmatpush3.msra.mxu1 %v341_v21  ;;  %859 = vmatprep.subr.mxu0 %v131_v22 }
  0x3e   :  { %915 = vmatprep.subr.mxu1 %v340_v23  ;;  %860 = vmatpush3.msra.mxu0 %v131_v22 }
  0x3f   :  { %916 = vmatpush3.msra.mxu1 %v340_v23  ;;  %861 = vmatprep.subr.mxu0 %v130_v24 }
  0x40   :  { %917 = vmatprep.subr.mxu1 %v339_v25  ;;  %862 = vmatpush3.msra.mxu0 %v130_v24 }
  0x41   :  { %918 = vmatpush3.msra.mxu1 %v339_v25  ;;  %863 = vmatprep.subr.mxu0 %v129_v26 }
  0x42   :  { %919 = vmatprep.subr.mxu1 %v338_v27  ;;  %864 = vmatpush3.msra.mxu0 %v129_v26 }
  0x43   :  { %920 = vmatpush3.msra.mxu1 %v338_v27  ;;  %865 = vmatprep.subr.mxu0 %v128_v28 }
  0x44   :  { %921 = vmatprep.subr.mxu1 %v337_v29  ;;  %866 = vmatpush3.msra.mxu0 %v128_v28 }
  0x45   :  { %922 = vmatpush3.msra.mxu1 %v337_v29  ;;  %867 = vmatprep.subr.mxu0 %v127_v30 }
  0x46   :  { %923 = vmatprep.subr.mxu1 %v336_v31  ;;  %868 = vmatpush3.msra.mxu0 %v127_v30 }
  0x47   :  { %869 = vmatprep.mubr.f32.mxu0 %v95_v32  ;;  %924 = vmatpush3.msra.mxu1 %v336_v31 }
  0x48   :  { %925 = vmatprep.mubr.f32.mxu1 %v95_v32  ;;  %870 = vmatmul.mubr.f32.vlgmr.msra.gmra.mxu0 %v96_v33 }
  0x49   :  { %926 = vmatmul.mubr.f32.vlgmr.msra.gmra.mxu1 %v96_v33  ;;  %872 = vmatprep.mubr.f32.mxu0 %v97_v34 }
  0x4a   :  { %928 = vmatprep.mubr.f32.mxu1 %v97_v34 }
  0x4c   :  { %873 = vmatmul.mubr.f32.gmra.mxu0 %v98_v35 }
  0x4d   :  { %929 = vmatmul.mubr.f32.gmra.mxu1 %v98_v35  ;;  %875 = vmatprep.mubr.f32.mxu0 %v99_v36 }
  0x4e   :  { %931 = vmatprep.mubr.f32.mxu1 %v99_v36 }
  0x50   :  { %876 = vmatmul.mubr.f32.gmra.mxu0 %v100_v37 }
  0x51   :  { %932 = vmatmul.mubr.f32.gmra.mxu1 %v100_v37  ;;  %878 = vmatprep.mubr.f32.mxu0 %v101_v38 }
  0x52   :  { %934 = vmatprep.mubr.f32.mxu1 %v101_v38 }
  0x54   :  { %879 = vmatmul.mubr.f32.gmra.mxu0 %v102_v39 }
  0x55   :  { %935 = vmatmul.mubr.f32.gmra.mxu1 %v102_v39  ;;  %881 = vmatprep.mubr.f32.mxu0 %v103_v40 }
  0x56   :  { %937 = vmatprep.mubr.f32.mxu1 %v103_v40 }
  0x58   :  { %882 = vmatmul.mubr.f32.gmra.mxu0 %v104_v41 }
  0x59   :  { %938 = vmatmul.mubr.f32.gmra.mxu1 %v104_v41  ;;  %884 = vmatprep.mubr.f32.mxu0 %v105_v42 }
  0x5a   :  { %940 = vmatprep.mubr.f32.mxu1 %v105_v42 }
  0x5c   :  { %885 = vmatmul.mubr.f32.gmra.mxu0 %v106_v43 }
  0x5d   :  { %941 = vmatmul.mubr.f32.gmra.mxu1 %v106_v43  ;;  %887 = vmatprep.mubr.f32.mxu0 %v107_v44 }
  0x5e   :  { %943 = vmatprep.mubr.f32.mxu1 %v107_v44 }
  0x60   :  { %888 = vmatmul.mubr.f32.gmra.mxu0 %v108_v45 }
  0x61   :  { %944 = vmatmul.mubr.f32.gmra.mxu1 %v108_v45  ;;  %890 = vmatprep.mubr.f32.mxu0 %v109_v46 }
  0x62   :  { %946 = vmatprep.mubr.f32.mxu1 %v109_v46 }
  0x64   :  { %891 = vmatmul.mubr.f32.gmra.mxu0 %v110_v47 }
  0x65   :  { %947 = vmatmul.mubr.f32.gmra.mxu1 %v110_v47 }
 0x108   :  { %v871_v48 = vpop.f32.mrf.mxu0 }
 0x109   :  { %v927_v49 = vpop.f32.mrf.mxu1 }
 0x10a   :  { %645 = vst [vmem:[#allocation11 + $0x8] sm:$0xff] %v927_v49  ;;  %v209_v50 = vpop.f32.mrf.mxu0 }
 0x10b   :  { %v418_v51 = vpop.f32.mrf.mxu1  ;;  %v729_v52 = vpack.c.bf16 %v871_v48, %v209_v50 }
 0x10c   :  { %644 = vst [vmem:[#allocation11] sm:$0xff] %v418_v51  ;;  %v874_v53 = vpop.f32.mrf.mxu0 }
 0x10d   :  { %v930_v54 = vpop.f32.mrf.mxu1  ;;  %730 = vst [vmem:[#allocation10] sm:$0xff] %v729_v52  }
 0x10e   :  { %647 = vst [vmem:[#allocation11 + $0x18] sm:$0xff] %v930_v54  ;;  %v219_v55 = vpop.f32.mrf.mxu0 }
 0x10f   :  { %v428_v56 = vpop.f32.mrf.mxu1  ;;  %v734_v57 = vpack.c.bf16 %v874_v53, %v219_v55 }
 0x110   :  { %646 = vst [vmem:[#allocation11 + $0x10] sm:$0xff] %v428_v56  ;;  %v877_v58 = vpop.f32.mrf.mxu0 }
 0x111   :  { %v933_v59 = vpop.f32.mrf.mxu1  ;;  %766 = vst [vmem:[#allocation10 + $0x8] sm:$0xff] %v734_v57  }
 0x112   :  { %649 = vst [vmem:[#allocation11 + $0x28] sm:$0xff] %v933_v59  ;;  %v229_v60 = vpop.f32.mrf.mxu0 }
 0x113   :  { %v438_v61 = vpop.f32.mrf.mxu1  ;;  %v739_v62 = vpack.c.bf16 %v877_v58, %v229_v60 }
 0x114   :  { %648 = vst [vmem:[#allocation11 + $0x20] sm:$0xff] %v438_v61  ;;  %v880_v63 = vpop.f32.mrf.mxu0 }
 0x115   :  { %v936_v0 = vpop.f32.mrf.mxu1  ;;  %767 = vst [vmem:[#allocation10 + $0x10] sm:$0xff] %v739_v62  }
 0x116   :  { %651 = vst [vmem:[#allocation11 + $0x38] sm:$0xff] %v936_v0  ;;  %v239_v1 = vpop.f32.mrf.mxu0 }
 0x117   :  { %v448_v2 = vpop.f32.mrf.mxu1  ;;  %v744_v3 = vpack.c.bf16 %v880_v63, %v239_v1 }
 0x118   :  { %650 = vst [vmem:[#allocation11 + $0x30] sm:$0xff] %v448_v2  ;;  %v883_v4 = vpop.f32.mrf.mxu0 }
 0x119   :  { %v939_v5 = vpop.f32.mrf.mxu1  ;;  %768 = vst [vmem:[#allocation10 + $0x18] sm:$0xff] %v744_v3  }
 0x11a   :  { %653 = vst [vmem:[#allocation11 + $0x48] sm:$0xff] %v939_v5  ;;  %v249_v6 = vpop.f32.mrf.mxu0 }
 0x11b   :  { %v458_v7 = vpop.f32.mrf.mxu1  ;;  %v749_v8 = vpack.c.bf16 %v883_v4, %v249_v6 }
 0x11c   :  { %652 = vst [vmem:[#allocation11 + $0x40] sm:$0xff] %v458_v7  ;;  %v886_v9 = vpop.f32.mrf.mxu0 }
 0x11d   :  { %v942_v10 = vpop.f32.mrf.mxu1  ;;  %769 = vst [vmem:[#allocation10 + $0x20] sm:$0xff] %v749_v8  }
 0x11e   :  { %655 = vst [vmem:[#allocation11 + $0x58] sm:$0xff] %v942_v10  ;;  %v259_v11 = vpop.f32.mrf.mxu0 }
 0x11f   :  { %v468_v12 = vpop.f32.mrf.mxu1  ;;  %v754_v13 = vpack.c.bf16 %v886_v9, %v259_v11 }
 0x120   :  { %654 = vst [vmem:[#allocation11 + $0x50] sm:$0xff] %v468_v12  ;;  %v889_v14 = vpop.f32.mrf.mxu0 }
 0x121   :  { %v945_v15 = vpop.f32.mrf.mxu1  ;;  %770 = vst [vmem:[#allocation10 + $0x28] sm:$0xff] %v754_v13  }
 0x122   :  { %657 = vst [vmem:[#allocation11 + $0x68] sm:$0xff] %v945_v15  ;;  %v269_v16 = vpop.f32.mrf.mxu0 }
 0x123   :  { %v478_v17 = vpop.f32.mrf.mxu1  ;;  %v759_v18 = vpack.c.bf16 %v889_v14, %v269_v16 }
 0x124   :  { %656 = vst [vmem:[#allocation11 + $0x60] sm:$0xff] %v478_v17  ;;  %v892_v19 = vpop.f32.mrf.mxu0 }
 0x125   :  { %v948_v20 = vpop.f32.mrf.mxu1  ;;  %771 = vst [vmem:[#allocation10 + $0x30] sm:$0xff] %v759_v18  }
 0x126   :  { %659 = vst [vmem:[#allocation11 + $0x78] sm:$0xff] %v948_v20  ;;  %v279_v21 = vpop.f32.mrf.mxu0 }
 0x127   :  { %v488_v22 = vpop.f32.mrf.mxu1  ;;  %v764_v23 = vpack.c.bf16 %v892_v19, %v279_v21 }
 0x128   :  { %658 = vst [vmem:[#allocation11 + $0x70] sm:$0xff] %v488_v22 }
 0x129   :  { %1029 = shalt.err (!%p1026_p5)
}
 0x12a   :  { %683 = dma.vmem_to_hbm [thread:$0]  %s678_s2, 2048, %s1131_s4, [#allocation12], %s1068_s20, %s1068_s20, %s1069_s21   ;;  %772 = vst [vmem:[#allocation10 + $0x38] sm:$0xff] %v764_v23  }
 0x12b   :  { %s1038_s10 = scalar_lea.vmem %s666_s6, 1024  ;;  %p1043_p7 = scmp.lt.s32.totalorder %s666_s6, %s666_s6 }
 0x12c   :  { %p1039_p6 = scmp.ne.s32.totalorder %s666_s6, %s1038_s10  ;;  %p1044_p8 = scmp.lt.s32.totalorder %s1038_s10, %s1038_s10 }
 0x12e   :  { %p1045_p9 = por %p1044_p8, %p1043_p7 }
 0x130   :  { %p1046_p10 = pnand %p1045_p9, %p1039_p6 }
 0x132   :  { %1049 = shalt.err (!%p1046_p10)
}
 0x133   :  { %s1073_s11 = smov 64   ;;  %s1074_s12 = smov 4  }
 0x134   :  { %671 = dma.vmem_to_hbm [thread:$0]  %s666_s6, 1024, %s1130_s3, [#allocation6], %s1073_s11, %s1073_s11, %s1074_s12  }
 0x135   :  { %1062 = dma.done.wait [#allocation6], 1024  }
 0x136   :  { %1063 = vsyncadd [#allocation6], 4294966272 }
 0x137   :  { %1064 = dma.done.wait [#allocation12], 2048  }
 0x138   :  { %1065 = vsyncadd [#allocation12], 4294965248 }
 0x139   :  { %690 = vsyncpa [#allocation5], 1 }
 0x13a   :  { %691 = vsyncpa [#allocation8], 1 }
 0x13b   :  { %692 = vsyncpa [#allocation6], 1 }
 0x13c   :  { %693 = vsyncpa [#allocation12], 1 }

</bundles_post_ra>
